<compile_context>
chip_gen: v5e
topology: v5e:2x2
jax: 0.10.0
libtpu: 0.0.40
codegen_flags: <defaults>
</compile_context>

<pallas_src>
import jax
import jax.numpy as jnp
from jax.experimental import pallas as pl
from jax.experimental.pallas import tpu as pltpu

WIDTH = 512           # lane-dense slab width (multiple of 128 -> unmasked vst)
TILE_ROWS_MAX = 512   # 512 rows x 512 lanes x 4 B = 1 MiB per stream per block


def _round_up(x, m):
    return (x + m - 1) // m * m


def _plant_kernel(params_ref, cmd_ref, t_ref, out_ref):
    # params (SMEM, f32[5]): [1/omega^2, x0, gamma, O, gamma/O]
    inv_omega2 = params_ref[0]
    x0 = params_ref[1]
    gamma = params_ref[2]
    big_o = params_ref[3]
    g_over_o = params_ref[4]

    t = t_ref[...]
    cmd = cmd_ref[...]

    # Transcendentals run on the EUP; fully hidden under the HBM-bound
    # load/store streams, and they replace 3 full f32 input streams.
    decay = jnp.exp(-gamma * t)
    restoration = jnp.cos(big_o * t)
    damping = g_over_o * jnp.sin(big_o * t)

    xf = cmd * inv_omega2
    out_ref[...] = xf + (x0 - xf) * decay * (restoration + damping)


def plant_dt_forward(commands, t_span, *, initial=0.0, gamma=0.1, omega=0.11):
    """JAX/Pallas equivalent of Plant_DT.forward (coefficient math fused)."""
    commands = jnp.asarray(commands, jnp.float32)
    t_span = jnp.asarray(t_span, jnp.float32)

    out_shape_logical = jnp.broadcast_shapes(commands.shape, t_span.shape)
    # TODO(synk): for large batched broadcasts (commands of shape (B, N)),
    # express the reuse of t_span in the BlockSpec index_map instead of
    # materializing a broadcast copy.  For the module's 1-D case (shapes
    # already equal) these broadcasts are no-ops.
    if commands.shape != out_shape_logical:
        commands = jnp.broadcast_to(commands, out_shape_logical)
    if t_span.shape != out_shape_logical:
        t_span = jnp.broadcast_to(t_span, out_shape_logical)

    n = 1
    for d in out_shape_logical:
        n *= int(d)

    # Lane-dense slab (rows, WIDTH); pad to a whole number of blocks.
    rows = pl.cdiv(n, WIDTH)
    tile_rows = min(TILE_ROWS_MAX, _round_up(max(rows, 1), 8))
    rows_padded = _round_up(rows, tile_rows)
    padded_n = rows_padded * WIDTH

    def to_slab(x):
        flat = x.reshape(-1)
        if padded_n != n:
            flat = jnp.pad(flat, (0, padded_n - n))
        return flat.reshape(rows_padded, WIDTH)

    cmd2 = to_slab(commands)
    t2 = to_slab(t_span)

    big_o = omega ** 2 - gamma ** 2
    params = jnp.array(
        [1.0 / (omega ** 2), initial, gamma, big_o, gamma / big_o],
        dtype=jnp.float32)

    grid = (rows_padded // tile_rows,)
    block_spec = pl.BlockSpec((tile_rows, WIDTH), lambda i: (i, 0))
    block_bytes = tile_rows * WIDTH * 4
    # 3 VMEM streams (cmd, t, out) x 2 double-buffers + headroom; keep it
    # comfortably below every generation's scoped-VMEM default.
    vmem_limit = int(max(16 * 1024 * 1024, 8 * block_bytes))

    out2 = pl.pallas_call(
        _plant_kernel,
        out_shape=jax.ShapeDtypeStruct((rows_padded, WIDTH), jnp.float32),
        grid_spec=pltpu.PrefetchScalarGridSpec(
            num_scalar_prefetch=0,
            grid=grid,
            in_specs=[
                pl.BlockSpec(memory_space=pltpu.MemorySpace.SMEM),  # params
                block_spec,                                         # commands
                block_spec,                                         # t_span
            ],
            out_specs=block_spec,
        ),
        compiler_params=pltpu.CompilerParams(
            dimension_semantics=("parallel",),
            vmem_limit_bytes=vmem_limit),
    )(params, cmd2, t2)

    return out2.reshape(-1)[:n].reshape(out_shape_logical)


def plant_dt_reference(commands, t_span, *, initial=0.0, gamma=0.1, omega=0.11):
    # Pure-JAX reference mirroring the PyTorch module exactly.
    commands = jnp.asarray(commands, jnp.float32)
    t_span = jnp.asarray(t_span, jnp.float32)
    big_o = omega ** 2 - gamma ** 2
    restoration = jnp.cos(big_o * t_span)
    damping = (gamma / big_o) * jnp.sin(big_o * t_span)
    decay = jnp.exp(-gamma * t_span)
    xf = commands / omega ** 2
    return xf + (initial - xf) * decay * (restoration + damping)


if __name__ == "__main__":
    key = jax.random.PRNGKey(0)

    # 1) The module's actual configuration: N = 1000 (non-multiple-of-1024,
    #    exercises the padding path).
    N = 1000
    t_span = jnp.linspace(0.0, 100.0, N, dtype=jnp.float32)
    commands = jax.random.normal(key, (N,), dtype=jnp.float32)

    out = plant_dt_forward(commands, t_span, initial=0.0, gamma=0.1, omega=0.11)
    out = jax.block_until_ready(out)
    ref = plant_dt_reference(commands, t_span, initial=0.0, gamma=0.1, omega=0.11)
    assert out.shape == ref.shape and out.dtype == jnp.float32
    assert jnp.allclose(out, ref, rtol=1e-4, atol=1e-4)

    # 2) A larger size that exercises multi-block pipelining + padding tail.
    N2 = 300_000
    t_span2 = jnp.linspace(0.0, 50.0, N2, dtype=jnp.float32)
    commands2 = jax.random.normal(jax.random.PRNGKey(0), (N2,), dtype=jnp.float32)
    out2 = jax.block_until_ready(
        plant_dt_forward(commands2, t_span2, initial=0.5, gamma=0.1, omega=0.11))
    ref2 = plant_dt_reference(commands2, t_span2, initial=0.5, gamma=0.1, omega=0.11)
    assert out2.shape == ref2.shape
    assert jnp.allclose(out2, ref2, rtol=1e-4, atol=1e-4)

    print("KERNEL_OK")
</pallas_src>

<mosaic_0001>
module attributes {stable_mosaic.version = 11 : i64} {
  func.func @_plant_kernel(%arg0: i32, %arg1: memref<5xf32, #tpu.memory_space<smem>>, %arg2: memref<8x512xf32, #tpu.memory_space<vmem>>, %arg3: memref<8x512xf32, #tpu.memory_space<vmem>>, %arg4: memref<8x512xf32, #tpu.memory_space<vmem>>) attributes {dimension_semantics = [#tpu.dimension_semantics<parallel>], iteration_bounds = array<i64: 1>, scalar_prefetch = 0 : i64, scratch_operands = 0 : i64, tpu.core_type = #tpu.core_type<tc>, window_params = [{transform_indices = @transform_0, window_bounds = array<i64: 5>}, {transform_indices = @transform_1, window_bounds = array<i64: 8, 512>}, {transform_indices = @transform_2, window_bounds = array<i64: 8, 512>}, {transform_indices = @transform_3, window_bounds = array<i64: 8, 512>}]} {
    %c0 = arith.constant 0 : index
    %0 = memref.load %arg1[%c0] : memref<5xf32, #tpu.memory_space<smem>>
    %c1 = arith.constant 1 : index
    %1 = memref.load %arg1[%c1] : memref<5xf32, #tpu.memory_space<smem>>
    %c2 = arith.constant 2 : index
    %2 = memref.load %arg1[%c2] : memref<5xf32, #tpu.memory_space<smem>>
    %c3 = arith.constant 3 : index
    %3 = memref.load %arg1[%c3] : memref<5xf32, #tpu.memory_space<smem>>
    %c4 = arith.constant 4 : index
    %4 = memref.load %arg1[%c4] : memref<5xf32, #tpu.memory_space<smem>>
    %c0_0 = arith.constant 0 : index
    %c0_1 = arith.constant 0 : index
    %5 = vector.load %arg3[%c0_0, %c0_1] : memref<8x512xf32, #tpu.memory_space<vmem>>, vector<8x512xf32>
    %c0_2 = arith.constant 0 : index
    %c0_3 = arith.constant 0 : index
    %6 = vector.load %arg2[%c0_2, %c0_3] : memref<8x512xf32, #tpu.memory_space<vmem>>, vector<8x512xf32>
    %cst = arith.constant 0.000000e+00 : f32
    %7 = arith.subf %cst, %2 : f32
    %8 = vector.broadcast %7 : f32 to vector<8x512xf32>
    %9 = arith.mulf %8, %5 : vector<8x512xf32>
    %10 = math.exp %9 : vector<8x512xf32>
    %11 = vector.broadcast %3 : f32 to vector<8x512xf32>
    %12 = arith.mulf %11, %5 : vector<8x512xf32>
    %13 = math.cos %12 : vector<8x512xf32>
    %14 = vector.broadcast %3 : f32 to vector<8x512xf32>
    %15 = arith.mulf %14, %5 : vector<8x512xf32>
    %16 = math.sin %15 : vector<8x512xf32>
    %17 = vector.broadcast %4 : f32 to vector<8x512xf32>
    %18 = arith.mulf %17, %16 : vector<8x512xf32>
    %19 = vector.broadcast %0 : f32 to vector<8x512xf32>
    %20 = arith.mulf %6, %19 : vector<8x512xf32>
    %21 = vector.broadcast %1 : f32 to vector<8x512xf32>
    %22 = arith.subf %21, %20 : vector<8x512xf32>
    %23 = arith.mulf %22, %10 : vector<8x512xf32>
    %24 = arith.addf %13, %18 : vector<8x512xf32>
    %25 = arith.mulf %23, %24 : vector<8x512xf32>
    %26 = arith.addf %20, %25 : vector<8x512xf32>
    %c0_4 = arith.constant 0 : index
    %c0_5 = arith.constant 0 : index
    %27 = vector.load %arg4[%c0_4, %c0_5] : memref<8x512xf32, #tpu.memory_space<vmem>>, vector<8x512xf32>
    tpu.vector_store %arg4[%c0_4, %c0_5], %26 {strides = array<i32>} : memref<8x512xf32, #tpu.memory_space<vmem>>, vector<8x512xf32>,
    return
  }
  func.func @transform_0(%arg0: i32) -> i32 {
    %c0_i32 = arith.constant 0 : i32
    %c0_i32_0 = arith.constant 0 : i32
    return %c0_i32 : i32
  }
  func.func @transform_1(%arg0: i32) -> (i32, i32) {
    %c0_i32 = arith.constant 0 : i32
    %c0_i32_0 = arith.constant 0 : i32
    return %arg0, %c0_i32 : i32, i32
  }
  func.func @transform_2(%arg0: i32) -> (i32, i32) {
    %c0_i32 = arith.constant 0 : i32
    %c0_i32_0 = arith.constant 0 : i32
    return %arg0, %c0_i32 : i32, i32
  }
  func.func @transform_3(%arg0: i32) -> (i32, i32) {
    %c0_i32 = arith.constant 0 : i32
    %c0_i32_0 = arith.constant 0 : i32
    return %arg0, %c0_i32 : i32, i32
  }
}

</mosaic_0001>

<bundles_post_ra>
// kernel: tpu_custom_call.1
= control target key start
LH: loop header
LB: loop body
LE: loop exit
PB: predicated region body
PF: predicated region fallthrough
CT: control target
= control target key end

     0   :  { %8 = vsyncpa [#allocation5], 0  ;;  %s2114_s0 = inlined_call_operand.hbm [shape: f32[5], index: 0, kind: input, shape index: {}]   ;;  %s2115_s1 = inlined_call_operand.hbm [shape: f32[8,512], index: 1, kind: input, shape index: {}]   ;;  %s2116_s2 = inlined_call_operand.hbm [shape: f32[8,512], index: 2, kind: input, shape index: {}]   ;;  %s2117_s3 = inlined_call_operand.hbm [shape: f32[8,512], index: 3, kind: output, shape index: {}]  }
   0x1   :  { %9 = vsyncpa [#allocation3], 0 }
   0x2   :  { %10 = vsyncpa [#allocation8], 0 }
   0x3   :  { %11 = vsyncpa [#allocation4], 0  ;;  %s17_s14 = sshll.u32 %s2114_s0, 4  ;;  %s26_s17 = sshll.u32 %s2115_s1, 4  ;;  %s18_s14 = int_to_ptr.hbm [resolvable:$true] %s17_s14  ;;  %s27_s17 = int_to_ptr.hbm [resolvable:$true] %s26_s17 }
   0x4   :  { %s1517_s18 = smov [#allocation2]   ;;  %s1518_s19 = smov [#allocation6]  }
   0x5   :  { %20 = dma.hbm_to_smem %s18_s14, 16, %s1517_s18, [#allocation5]  }
   0x6   :  { %s28_s20 = sshll.u32 %s1518_s19, 4  ;;  %s37_s23 = sshll.u32 %s2116_s2, 4  ;;  %s29_s20 = int_to_ptr.vmem [resolvable:$true] %s28_s20  ;;  %s38_s23 = int_to_ptr.hbm [resolvable:$true] %s37_s23 }
   0x7   :  { %31 = dma.hbm_to_vmem [thread:$0]  %s27_s17, 512, %s29_s20, [#allocation3]  }
   0x8   :  { %s1519_s24 = smov [#allocation7]  }
   0x9   :  { %s39_s25 = sshll.u32 %s1519_s24, 4  ;;  %s40_s25 = int_to_ptr.vmem [resolvable:$true] %s39_s25 }
   0xa   :  { %42 = dma.hbm_to_vmem [thread:$0]  %s38_s23, 512, %s40_s25, [#allocation8]  }
   0xb   :  { %1509 = dma.done.wait [#allocation5], 16  }
   0xc   :  { %1510 = vsyncadd [#allocation5], 4294967280 }
   0xd   :  { %1511 = dma.done.wait [#allocation3], 512  }
   0xe   :  { %1512 = vsyncadd [#allocation3], 4294966784 }
   0xf   :  { %1513 = dma.done.wait [#allocation8], 512  }
  0x10   :  { %1514 = vsyncadd [#allocation8], 4294966784 }
  0x11   :  { %55 = sfence }
  0x12   :  { %s1380_s0 = sld [smem:[#allocation2 + $0x3]]  ;;  %v1557_v0 = vld [vmem:[#allocation7] sm:$0xff]  ;;  %v1559_v1 = vld [vmem:[#allocation7 + $0x8] sm:$0xff]  ;;  %v1571_v5 = vld [vmem:[#allocation7 + $0x10] sm:$0xff]  ;;  %v1520_v28 = vmov 683565275  }
  0x13   :  { %v1521_v30 = vmov 2475754826   ;;  %v1522_v32 = vmov 2131351028   ;;  %v1523_v34 = vmov 2102212464  }
  0x14   :  { %v1524_v36 = vmov 920167782   ;;  %v1525_v45 = vmov 1326507024   ;;  %s1907_s1 = sld [smem:[#allocation2 + $0x2]]  ;;  %s1527_s29 = smov [#allocation9]  }
  0x15   :  { %s2034_s26 = sld [smem:[#allocation2 + $0x4]]  ;;  %s1364_s30 = sshll.u32 %s1527_s29, 4  ;;  %s1365_s30 = int_to_ptr.vmem [resolvable:$true] %s1364_s30 }
  0x16   :  { %s2043_s27 = sld [smem:[#allocation2]]  ;;  %s1366_s6 = sshll.u32 %s2117_s3, 4  ;;  %s1367_s6 = int_to_ptr.hbm [resolvable:$true] %s1366_s6 }
  0x17   :  { %s2045_s28 = sld [smem:[#allocation2 + $0x1]] }
  0x18   :  { %v1561_v2 = vstv %s1380_s0 }
  0x19   :  { %v1565_v3 = vmul.f32 %v1561_v2, %v1557_v0  ;;  %v1569_v4 = vmul.f32 %v1561_v2, %v1559_v1  ;;  %v1578_v10 = vmul.f32 %v1561_v2, %v1571_v5 }
  0x1a   :  { %s69_s2 = ssub.f32 0.0, %s1907_s1 }
  0x1b   :  { %v88_v6 = vand.u32 2147483647, %v1565_v3  ;;  %v91_v7 = vand.u32 2139095040, %v1565_v3  ;;  %v245_v9 = vand.u32 2139095040, %v1569_v4  ;;  %v242_v12 = vand.u32 2147483647, %v1569_v4 }
  0x1c   :  { %v399_v19 = vand.u32 2139095040, %v1578_v10 }
  0x1d   :  { %v92_v8 = vshrl.u32 %v91_v7, 23  ;;  %v95_v11 = vand.u32 8388607, %v88_v6  ;;  %v246_v14 = vshrl.u32 %v245_v9, 23  ;;  %v249_v18 = vand.u32 8388607, %v242_v12 }
  0x1e   :  { %v1588_v26 = vshrl.u32 %v399_v19, 23 }
  0x1f   :  { %v1382_v13 = vadd.s32 4294967169, %v92_v8  ;;  %v96_v15 = vor.u32 8388608, %v95_v11  ;;  %v1385_v17 = vadd.s32 4294967169, %v246_v14  ;;  %v250_v25 = vor.u32 8388608, %v249_v18 }
  0x21   :  { %v98_v16 = vadd.s32 1, %v1382_v13  ;;  %v252_v20 = vadd.s32 1, %v1385_v17  ;;  %v1586_v22 = vshll.u32 %v96_v15, 8  ;;  %v1609_v7 = vshll.u32 %v250_v25, 8 }
  0x23   :  { %vm99_vm0 = vcmp.gt.s32.totalorder %v98_v16, 0  ;;  %vm253_vm1 = vcmp.gt.s32.totalorder %v252_v20, 0  ;;  %v137_v38 = vand.u32 65535, %v1586_v22  ;;  %v138_v63 = vshrl.u32 %v1586_v22, 16 }
  0x24   :  { %v100_v21 = vsel %vm99_vm0, %v98_v16, 0  ;;  %v254_v39 = vsel %vm253_vm1, %v252_v20, 0 }
  0x25   :  { %v102_v23 = vand.u32 31, %v100_v21  ;;  %v101_v24 = vshrl.u32 %v100_v21, 5  ;;  %v1603_v52 = vand.u32 31, %v254_v39  ;;  %v1616_v13 = vshrl.u32 %v254_v39, 5 }
  0x27   :  { %v103_v27 = vsub.s32 32, %v102_v23  ;;  %v105_v29 = vshll.u32 %v1520_v28, %v102_v23  ;;  %v108_v31 = vshll.u32 %v1521_v30, %v102_v23  ;;  %v111_v33 = vshll.u32 %v1522_v32, %v102_v23 }
  0x28   :  { %v114_v35 = vshll.u32 %v1523_v34, %v102_v23  ;;  %v117_v37 = vshll.u32 %v1524_v36, %v102_v23  ;;  %vm120_vm2 = vcmp.lt.s32.totalorder %v101_v24, 1  ;;  %vm121_vm3 = vcmp.lt.s32.totalorder %v101_v24, 2 }
  0x29   :  { %v104_v40 = vshrl.u32 %v1520_v28, %v103_v27  ;;  %v106_v41 = vshrl.u32 %v1521_v30, %v103_v27  ;;  %v109_v42 = vshrl.u32 %v1522_v32, %v103_v27  ;;  %v112_v43 = vshrl.u32 %v1523_v34, %v103_v27 }
  0x2a   :  { %v115_v44 = vshrl.u32 %v1524_v36, %v103_v27  ;;  %v118_v46 = vshrl.u32 %v1525_v45, %v103_v27  ;;  %vm123_vm4 = vcmp.lt.s32.totalorder %v101_v24, 4  ;;  %vm122_vm5 = vcmp.lt.s32.totalorder %v101_v24, 3 }
  0x2b   :  { %v107_v47 = vor.u32 %v106_v41, %v105_v29  ;;  %v110_v48 = vor.u32 %v109_v42, %v108_v31  ;;  %v113_v49 = vor.u32 %v112_v43, %v111_v33  ;;  %v1606_v60 = vsub.s32 32, %v1603_v52 }
  0x2c   :  { %v116_v50 = vor.u32 %v115_v44, %v114_v35  ;;  %v119_v51 = vor.u32 %v118_v46, %v117_v37  ;;  %v259_v18 = vshll.u32 %v1520_v28, %v1603_v52  ;;  %v262_v20 = vshll.u32 %v1521_v30, %v1603_v52 }
  0x2d   :  { %v124_v53 = vsel %vm120_vm2, %v104_v40, %v107_v47  ;;  %v125_v54 = vsel %vm123_vm4, %v113_v49, 2102212464  ;;  %v128_v55 = vsel %vm120_vm2, %v107_v47, %v110_v48  ;;  %v132_v56 = vsel %vm120_vm2, %v110_v48, %v113_v49 }
  0x2e   :  { %v126_v57 = vsel %vm122_vm5, %v110_v48, %v125_v54  ;;  %v129_v58 = vsel %vm123_vm4, %v116_v50, 920167782  ;;  %v133_v59 = vsel %vm123_vm4, %v119_v51, 1326507024  ;;  %v260_v19 = vshrl.u32 %v1521_v30, %v1606_v60 }
  0x2f   :  { %v130_v61 = vsel %vm122_vm5, %v113_v49, %v129_v58  ;;  %v134_v62 = vsel %vm122_vm5, %v116_v50, %v133_v59  ;;  %v1612_v8 = vsel %vm121_vm3, %v124_v53, %v126_v57  ;;  %v263_v21 = vshrl.u32 %v1522_v32, %v1606_v60 }
  0x30   :  { %v131_v9 = vsel %vm121_vm3, %v128_v55, %v130_v61  ;;  %v135_v11 = vsel %vm121_vm3, %v132_v56, %v134_v62  ;;  %v265_v27 = vshll.u32 %v1522_v32, %v1603_v52  ;;  %v1628_v49 = vor.u32 %v260_v19, %v259_v18 }
  0x31   :  { %v139_v14 = vand.u32 65535, %v135_v11  ;;  %v140_v15 = vshrl.u32 %v135_v11, 16  ;;  %v161_v16 = vand.u32 65535, %v131_v9  ;;  %v162_v17 = vshrl.u32 %v131_v9, 16 }
  0x32   :  { %v1526_v50 = vmov 0   ;;  %v268_v56 = vshll.u32 %v1523_v34, %v1603_v52  ;;  %v264_v59 = vor.u32 %v263_v21, %v262_v20  ;;  %v269_v9 = vshrl.u32 %v1524_v36, %v1606_v60 }
  0x33   :  { %v141_v23 = vmul.u32 %v139_v14, %v137_v38  ;;  %v142_v24 = vmul.u32 %v140_v15, %v137_v38  ;;  %v143_v25 = vmul.u32 %v139_v14, %v138_v63  ;;  %v144_v29 = vmul.u32 %v140_v15, %v138_v63 }
  0x34   :  { %v163_v31 = vmul.u32 %v161_v16, %v137_v38  ;;  %v164_v33 = vmul.u32 %v162_v17, %v137_v38  ;;  %v165_v35 = vmul.u32 %v161_v16, %v138_v63  ;;  %v166_v41 = vmul.u32 %v162_v17, %v138_v63 }
  0x35   :  { %v145_v37 = vshll.u32 %v142_v24, 16  ;;  %v146_v39 = vshrl.u32 %v142_v24, 16  ;;  %v147_v40 = vshll.u32 %v143_v25, 16  ;;  %v148_v42 = vshrl.u32 %v143_v25, 16 }
  0x36   :  { %v167_v43 = vshll.u32 %v164_v33, 16  ;;  %v168_v44 = vshrl.u32 %v164_v33, 16  ;;  %v169_v46 = vshll.u32 %v165_v35, 16  ;;  %v170_v48 = vshrl.u32 %v165_v35, 16 }
  0x37   :  { %vm149_vm6 = vc.u32 %v141_v23, %v145_v37  ;;  %v151_v47 = vadd.s32 %v145_v37, %v141_v23  ;;  %v266_v38 = vshrl.u32 %v1523_v34, %v1606_v60  ;;  %v271_v14 = vshll.u32 %v1524_v36, %v1603_v52 }
  0x38   :  { %v150_v51 = vsel %vm149_vm6, 1, %v1526_v50  ;;  %vm171_vm7 = vc.u32 %v163_v31, %v167_v43  ;;  %v173_v53 = vadd.s32 %v167_v43, %v163_v31  ;;  %v272_v15 = vshrl.u32 %v1525_v45, %v1606_v60 }
  0x39   :  { %v152_v54 = vadd.s32 %v150_v51, %v144_v29  ;;  %vm153_vm8 = vc.u32 %v151_v47, %v147_v40  ;;  %v172_v55 = vsel %vm171_vm7, 1, %v1526_v50  ;;  %v267_v63 = vor.u32 %v266_v38, %v265_v27 }
  0x3a   :  { %v154_v57 = vsel %vm153_vm8, 1, %v1526_v50  ;;  %v174_v58 = vadd.s32 %v172_v55, %v166_v41  ;;  %vm175_vm9 = vc.u32 %v173_v53, %v169_v46  ;;  %vm274_vm10 = vcmp.lt.s32.totalorder %v1616_v13, 1 }
  0x3b   :  { %v156_v61 = vadd.s32 %v154_v57, %v152_v54  ;;  %v176_v62 = vsel %vm175_vm9, 1, %v1526_v50  ;;  %v1645_v17 = vadd.s32 %v173_v53, %v169_v46  ;;  %v270_v18 = vor.u32 %v269_v9, %v268_v56 }
  0x3c   :  { %v178_v11 = vadd.s32 %v176_v62, %v174_v58  ;;  %vm276_vm11 = vcmp.lt.s32.totalorder %v1616_v13, 3  ;;  %v273_v20 = vor.u32 %v272_v15, %v271_v14  ;;  %vm275_vm12 = vcmp.lt.s32.totalorder %v1616_v13, 2 }
  0x3d   :  { %v157_v16 = vadd.s32 %v156_v61, %v146_v39  ;;  %vm277_vm13 = vcmp.lt.s32.totalorder %v1616_v13, 4  ;;  %v282_v52 = vsel %vm274_vm10, %v1628_v49, %v264_v59  ;;  %v1388_v24 = vadd.s32 4294967169, %v1588_v26 }
  0x3e   :  { %v179_v19 = vadd.s32 %v178_v11, %v168_v44  ;;  %v283_v23 = vsel %vm277_vm13, %v270_v18, 920167782  ;;  %v291_v29 = vand.u32 65535, %v1609_v7  ;;  %v292_v31 = vshrl.u32 %v1609_v7, 16 }
  0x3f   :  { %v1650_v21 = vadd.s32 %v157_v16, %v148_v42  ;;  %v284_v27 = vsel %vm276_vm11, %v267_v63, %v283_v23  ;;  %v181_v33 = vmul.u32 %v1586_v22, %v1612_v8  ;;  %v286_v26 = vsel %vm274_vm10, %v264_v59, %v267_v63 }
  0x40   :  { %v180_v25 = vadd.s32 %v179_v19, %v170_v48  ;;  %v285_v35 = vsel %vm275_vm12, %v282_v52, %v284_v27  ;;  %v287_v39 = vsel %vm277_vm13, %v273_v20, 1326507024  ;;  %v406_v43 = vadd.s32 1, %v1388_v24 }
  0x41   :  { %vm183_vm14 = vc.u32 %v1650_v21, %v1645_v17  ;;  %v315_v40 = vand.u32 65535, %v285_v35  ;;  %v316_v41 = vshrl.u32 %v285_v35, 16  ;;  %v288_v42 = vsel %vm276_vm11, %v270_v18, %v287_v39 }
  0x42   :  { %v184_v37 = vadd.s32 1, %v180_v25  ;;  %v258_v8 = vshrl.u32 %v1520_v28, %v1606_v60  ;;  %v289_v44 = vsel %vm275_vm12, %v286_v26, %v288_v42  ;;  %v279_v53 = vsel %vm277_vm13, %v267_v63, 2102212464 }
  0x43   :  { %v318_v46 = vmul.u32 %v316_v41, %v291_v29  ;;  %v293_v48 = vand.u32 65535, %v289_v44  ;;  %v294_v51 = vshrl.u32 %v289_v44, 16  ;;  %v317_v38 = vmul.u32 %v315_v40, %v291_v29 }
  0x44   :  { %v185_v22 = vsel %vm183_vm14, %v184_v37, %v180_v25  ;;  %v319_v54 = vmul.u32 %v315_v40, %v292_v31  ;;  %v278_v60 = vsel %vm274_vm10, %v258_v8, %v1628_v49  ;;  %vm407_vm15 = vcmp.gt.s32.totalorder %v406_v43, 0 }
  0x45   :  { %v186_v47 = vadd.s32 %v185_v22, %v181_v33  ;;  %v321_v55 = vshll.u32 %v318_v46, 16  ;;  %v295_v57 = vmul.u32 %v293_v48, %v291_v29  ;;  %v296_v58 = vmul.u32 %v294_v51, %v291_v29 }
  0x46   :  { %v297_v61 = vmul.u32 %v293_v48, %v292_v31  ;;  %v323_v62 = vshll.u32 %v319_v54, 16  ;;  %v298_v11 = vmul.u32 %v294_v51, %v292_v31  ;;  %v280_v63 = vsel %vm276_vm11, %v264_v59, %v279_v53 }
  0x47   :  { %v187_v56 = vadd.s32 536870912, %v186_v47  ;;  %v299_v14 = vshll.u32 %v296_v58, 16  ;;  %v320_v16 = vmul.u32 %v316_v41, %v292_v31  ;;  %vm325_vm0 = vc.u32 %v317_v38, %v321_v55 }
  0x48   :  { %v301_v15 = vshll.u32 %v297_v61, 16  ;;  %v327_v18 = vadd.s32 %v321_v55, %v317_v38  ;;  %v408_v52 = vsel %vm407_vm15, %v406_v43, 0  ;;  %v322_v23 = vshrl.u32 %v318_v46, 16 }
  0x49   :  { %v1683_v9 = vshrl.u32 %v187_v56, 30  ;;  %vm303_vm1 = vc.u32 %v295_v57, %v299_v14  ;;  %v305_v20 = vadd.s32 %v299_v14, %v295_v57  ;;  %v326_v24 = vsel %vm325_vm0, 1, %v1526_v50 }
  0x4a   :  { %v304_v49 = vsel %vm303_vm1, 1, %v1526_v50  ;;  %vm329_vm2 = vc.u32 %v327_v18, %v323_v62  ;;  %v300_v27 = vshrl.u32 %v296_v58, 16  ;;  %v302_v59 = vshrl.u32 %v297_v61, 16 }
  0x4b   :  { %v189_v19 = vshll.u32 %v1683_v9, 30  ;;  %v306_v29 = vadd.s32 %v304_v49, %v298_v11  ;;  %vm307_vm3 = vc.u32 %v305_v20, %v301_v15  ;;  %v328_v33 = vadd.s32 %v326_v24, %v320_v16 }
  0x4c   :  { %v308_v31 = vsel %vm307_vm3, 1, %v1526_v50  ;;  %v330_v35 = vsel %vm329_vm2, 1, %v1526_v50  ;;  %v410_v39 = vand.u32 31, %v408_v52  ;;  %v324_v40 = vshrl.u32 %v319_v54, 16 }
  0x4d   :  { %v1690_v25 = vsub.s32 %v186_v47, %v189_v19  ;;  %v310_v37 = vadd.s32 %v308_v31, %v306_v29  ;;  %v332_v41 = vadd.s32 %v330_v35, %v328_v33  ;;  %v396_v42 = vand.u32 2147483647, %v1578_v10 }
  0x4e   :  { %v281_v22 = vsel %vm275_vm12, %v278_v60, %v280_v63  ;;  %v1700_v46 = vadd.s32 %v327_v18, %v323_v62  ;;  %v1702_v48 = vsub.s32 32, %v410_v39  ;;  %v1709_v56 = vshrl.u32 %v408_v52, 5 }
  0x4f   :  { %vm191_vm4 = vcmp.lt.s32.totalorder %v1690_v25, 0  ;;  %v192_v26 = vsub.s32 0, %v1690_v25  ;;  %v311_v8 = vadd.s32 %v310_v37, %v300_v27  ;;  %v333_v47 = vadd.s32 %v332_v41, %v322_v23 }
  0x50   :  { %v335_v54 = vmul.u32 %v1609_v7, %v281_v22  ;;  %v403_v55 = vand.u32 8388607, %v396_v42  ;;  %v413_v13 = vshll.u32 %v1520_v28, %v410_v39  ;;  %v416_v57 = vshll.u32 %v1521_v30, %v410_v39 }
  0x51   :  { %v193_v43 = vsel %vm191_vm4, %v192_v26, %v1690_v25  ;;  %v1704_v51 = vadd.s32 %v311_v8, %v302_v59  ;;  %v334_v38 = vadd.s32 %v333_v47, %v324_v40  ;;  %v422_v58 = vshll.u32 %v1523_v34, %v410_v39 }
  0x52   :  { %v194_v44 = vclz %v193_v43  ;;  %v414_v60 = vshrl.u32 %v1521_v30, %v1702_v48  ;;  %v417_v7 = vshrl.u32 %v1522_v32, %v1702_v48  ;;  %v419_v62 = vshll.u32 %v1522_v32, %v410_v39 }
  0x53   :  { %vm337_vm5 = vc.u32 %v1704_v51, %v1700_v46  ;;  %v338_v61 = vadd.s32 1, %v334_v38  ;;  %v420_v11 = vshrl.u32 %v1523_v34, %v1702_v48  ;;  %v423_v14 = vshrl.u32 %v1524_v36, %v1702_v48 }
  0x54   :  { %v1383_v53 = vadd.s32 4294967294, %v194_v44  ;;  %v425_v15 = vshll.u32 %v1524_v36, %v410_v39  ;;  %v404_v16 = vor.u32 8388608, %v403_v55  ;;  %v426_v19 = vshrl.u32 %v1525_v45, %v1702_v48 }
  0x55   :  { %v339_v63 = vsel %vm337_vm5, %v338_v61, %v334_v38  ;;  %v424_v18 = vor.u32 %v423_v14, %v422_v58  ;;  %v1728_v52 = vor.u32 %v414_v60, %v413_v13  ;;  %v1730_v49 = vor.u32 %v417_v7, %v416_v57 }
  0x56   :  { %vm1384_vm6 = vcmp.lt.s32.totalorder %v1383_v53, 0  ;;  %v340_v20 = vadd.s32 %v339_v63, %v335_v54  ;;  %vm428_vm7 = vcmp.lt.s32.totalorder %v1709_v56, 1  ;;  %v1733_v24 = vor.u32 %v420_v11, %v419_v62 }
  0x57   :  { %v197_v23 = vsel %vm1384_vm6, 0, %v1383_v53  ;;  %v427_v27 = vor.u32 %v426_v19, %v425_v15  ;;  %vm431_vm8 = vcmp.lt.s32.totalorder %v1709_v56, 4  ;;  %vm430_vm9 = vcmp.lt.s32.totalorder %v1709_v56, 3 }
  0x58   :  { %v341_v29 = vadd.s32 536870912, %v340_v20  ;;  %v437_v59 = vsel %vm431_vm8, %v424_v18, 920167782  ;;  %v1739_v31 = vshll.u32 %v404_v16, 8  ;;  %v202_v33 = vsub.s32 4294967266, %v197_v23 }
  0x59   :  { %vm429_vm10 = vcmp.lt.s32.totalorder %v1709_v56, 2  ;;  %v436_v26 = vsel %vm428_vm7, %v1728_v52, %v1730_v49  ;;  %v438_v37 = vsel %vm430_vm9, %v1733_v24, %v437_v59  ;;  %v440_v39 = vsel %vm428_vm7, %v1730_v49, %v1733_v24 }
  0x5a   :  { %v1741_v35 = vshrl.u32 %v341_v29, 30  ;;  %v441_v40 = vsel %vm431_vm8, %v427_v27, 1326507024  ;;  %v182_v41 = vadd.s32 %v1645_v17, %v1650_v21  ;;  %v439_v22 = vsel %vm429_vm10, %v436_v26, %v438_v37 }
  0x5b   :  { %v442_v8 = vsel %vm430_vm9, %v424_v18, %v441_v40  ;;  %v445_v44 = vand.u32 65535, %v1739_v31  ;;  %v446_v47 = vshrl.u32 %v1739_v31, 16  ;;  %v198_v53 = vsub.s32 32, %v197_v23 }
  0x5c   :  { %v343_v43 = vshll.u32 %v1741_v35, 30  ;;  %v203_v38 = vadd.s32 127, %v202_v33  ;;  %v443_v55 = vsel %vm429_vm10, %v440_v39, %v442_v8  ;;  %v470_v57 = vshrl.u32 %v439_v22, 16 }
  0x5d   :  { %v447_v13 = vand.u32 65535, %v443_v55  ;;  %v448_v17 = vshrl.u32 %v443_v55, 16  ;;  %v199_v7 = vshll.u32 %v1690_v25, %v197_v23  ;;  %v200_v62 = vshrl.u32 %v182_v41, %v198_v53  ;;  %v1772_v53 = vld [vmem:[#allocation7 + $0x18] sm:$0xff] }
  0x5e   :  { %v344_v54 = vsub.s32 %v340_v20, %v343_v43  ;;  %v204_v11 = vshll.u32 %v203_v38, 23  ;;  %v469_v18 = vand.u32 65535, %v439_v22  ;;  %v472_v20 = vmul.u32 %v470_v57, %v445_v44 }
  0x5f   :  { %v449_v58 = vmul.u32 %v447_v13, %v445_v44  ;;  %v450_v61 = vmul.u32 %v448_v17, %v445_v44  ;;  %v451_v60 = vmul.u32 %v447_v13, %v446_v47  ;;  %v452_v63 = vmul.u32 %v448_v17, %v446_v47 }
  0x60   :  { %vm345_vm11 = vcmp.lt.s32.totalorder %v344_v54, 0  ;;  %v346_v21 = vsub.s32 0, %v344_v54  ;;  %v201_v59 = vor.u32 %v200_v62, %v199_v7  ;;  %v336_v33 = vadd.s32 %v1700_v46, %v1704_v51 }
  0x61   :  { %v453_v16 = vshll.u32 %v450_v61, 16  ;;  %v455_v19 = vshll.u32 %v451_v60, 16  ;;  %v205_v37 = vor.u32 4788187, %v204_v11  ;;  %v471_v23 = vmul.u32 %v469_v18, %v445_v44 }
  0x62   :  { %v347_v14 = vsel %vm345_vm11, %v346_v21, %v344_v54  ;;  %v473_v40 = vmul.u32 %v469_v18, %v446_v47  ;;  %v475_v41 = vshll.u32 %v472_v20, 16  ;;  %v412_v38 = vshrl.u32 %v1520_v28, %v1702_v48 }
  0x63   :  { %v348_v15 = vclz %v347_v14  ;;  %vm457_vm12 = vc.u32 %v449_v58, %v453_v16  ;;  %v459_v29 = vadd.s32 %v453_v16, %v449_v58  ;;  %v474_v51 = vmul.u32 %v470_v57, %v446_v47 }
  0x64   :  { %v458_v26 = vsel %vm457_vm12, 1, %v1526_v50  ;;  %v454_v17 = vshrl.u32 %v450_v61, 16  ;;  %v206_v44 = vand.u32 2147483647, %v205_v37  ;;  %v208_v58 = vcvt.s32.f32 %v201_v59 }
  0x65   :  { %v1386_v27 = vadd.s32 4294967294, %v348_v15  ;;  %v460_v25 = vadd.s32 %v458_v26, %v452_v63  ;;  %vm461_vm14 = vc.u32 %v459_v29, %v455_v19  ;;  %v477_v7 = vshll.u32 %v473_v40, 16 }
  0x66   :  { %v462_v46 = vsel %vm461_vm14, 1, %v1526_v50  ;;  %vm479_vm15 = vc.u32 %v471_v23, %v475_v41  ;;  %v433_v48 = vsel %vm431_vm8, %v1733_v24, 2102212464  ;;  %v481_v47 = vadd.s32 %v475_v41, %v471_v23 }
  0x67   :  { %vm1387_vm13 = vcmp.lt.s32.totalorder %v1386_v27, 0  ;;  %v464_v21 = vadd.s32 %v462_v46, %v460_v25  ;;  %v480_v14 = vsel %vm479_vm15, 1, %v1526_v50  ;;  %v432_v15 = vsel %vm428_vm7, %v412_v38, %v1728_v52 }
  0x68   :  { %v351_v39 = vsel %vm1387_vm13, 0, %v1386_v27  ;;  %v482_v57 = vadd.s32 %v480_v14, %v474_v51  ;;  %v456_v63 = vshrl.u32 %v451_v60, 16  ;;  %v209_v18 = vmul.f32 %v208_v58, %v206_v44 }
  0x69   :  { %v352_v43 = vsub.s32 32, %v351_v39  ;;  %v353_v22 = vshll.u32 %v344_v54, %v351_v39  ;;  %v356_v8 = vsub.s32 4294967266, %v351_v39  ;;  %v1779_v54 = vmul.f32 %v1561_v2, %v1772_v53 }
  0x6a   :  { %v465_v16 = vadd.s32 %v464_v21, %v454_v17  ;;  %v476_v19 = vshrl.u32 %v472_v20, 16  ;;  %vm483_vm0 = vc.u32 %v481_v47, %v477_v7  ;;  %v434_v29 = vsel %vm430_vm9, %v1730_v49, %v433_v48 }
  0x6b   :  { %v354_v55 = vshrl.u32 %v336_v33, %v352_v43  ;;  %v357_v13 = vadd.s32 127, %v356_v8  ;;  %v484_v24 = vsel %vm483_vm0, 1, %v1526_v50  ;;  %v553_v59 = vand.u32 2139095040, %v1779_v54 }
  0x6c   :  { %v478_v33 = vshrl.u32 %v473_v40, 16  ;;  %v486_v26 = vadd.s32 %v484_v24, %v482_v57  ;;  %v1793_v37 = vadd.s32 %v465_v16, %v456_v63  ;;  %v1795_v52 = vadd.s32 %v481_v47, %v477_v7 }
  0x6d   :  { %v355_v62 = vor.u32 %v354_v55, %v353_v22  ;;  %v358_v11 = vshll.u32 %v357_v13, 23  ;;  %v554_v60 = vshrl.u32 %v553_v59, 23  ;;  %v210_v25 = vxor.u32 2147483648, %v209_v18 }
  0x6e   :  { %v435_v20 = vsel %vm429_vm10, %v432_v15, %v434_v29  ;;  %v487_v39 = vadd.s32 %v486_v26, %v476_v19  ;;  %vm90_vm1 = vcmp.lt.s32.totalorder %v1565_v3, 0  ;;  %vm491_vm2 = vc.u32 %v1793_v37, %v1795_v52 }
  0x6f   :  { %v359_v61 = vor.u32 4788187, %v358_v11  ;;  %v362_v2 = vcvt.s32.f32 %v355_v62  ;;  %v1391_v49 = vadd.s32 4294967169, %v554_v60  ;;  %v489_v43 = vmul.u32 %v1739_v31, %v435_v20 }
  0x70   :  { %v488_v41 = vadd.s32 %v487_v39, %v478_v33  ;;  %vm1805_vm3 = vcmp.le.f32.partialorder %v88_v6, 0.7853982  ;;  %v211_v56 = vsel %vm90_vm1, %v210_v25, %v209_v18  ;;  %vm244_vm4 = vcmp.lt.s32.totalorder %v1569_v4, 0 }
  0x71   :  { %v360_v27 = vand.u32 2147483647, %v359_v61  ;;  %v560_v40 = vadd.s32 1, %v1391_v49  ;;  %v1815_v51 = vsel %vm1805_vm3, %v1565_v3, %v211_v56  ;;  %v550_v6 = vand.u32 2147483647, %v1779_v54 }
  0x72   :  { %v492_v38 = vadd.s32 1, %v488_v41  ;;  %vm1820_vm6 = vcmp.le.f32.partialorder %v242_v12, 0.7853982  ;;  %v1828_v58 = vmul.f32 %v1815_v51, %v1815_v51  ;;  %v212_v56 = vsub.s32 4, %v1683_v9 }
  0x73   :  { %v363_v23 = vmul.f32 %v362_v2, %v360_v27  ;;  %vm561_vm5 = vcmp.gt.s32.totalorder %v560_v40, 0  ;;  %v557_v11 = vand.u32 8388607, %v550_v6  ;;  %vm398_vm13 = vcmp.lt.s32.totalorder %v1578_v10, 0 }
  0x74   :  { %v493_v46 = vsel %vm491_vm2, %v492_v38, %v488_v41  ;;  %v562_v31 = vsel %vm561_vm5, %v560_v40, 0  ;;  %v224_v2 = vmul.f32 -0.00019511016, %v1828_v58  ;;  %v217_v25 = vmul.f32 -0.001358992, %v1828_v58 }
  0x75   :  { %v364_v8 = vxor.u32 2147483648, %v363_v23  ;;  %v494_v55 = vadd.s32 %v493_v46, %v489_v43  ;;  %v564_v21 = vand.u32 31, %v562_v31  ;;  %v1849_v63 = vshrl.u32 %v562_v31, 5 }
  0x76   :  { %v558_v29 = vor.u32 8388608, %v557_v11  ;;  %v490_v11 = vadd.s32 %v1795_v52, %v1793_v37  ;;  %vm1911_vm14 = vcmp.le.f32.partialorder %v396_v42, 0.7853982 }
  0x77   :  { %v365_v17 = vsel %vm244_vm4, %v364_v8, %v363_v23  ;;  %v495_v44 = vadd.s32 536870912, %v494_v55  ;;  %v1830_v7 = vsub.s32 32, %v564_v21  ;;  %v567_v14 = vshll.u32 %v1520_v28, %v564_v21 }
  0x78   :  { %v1835_v62 = vsel %vm1820_vm6, %v1569_v4, %v365_v17  ;;  %v570_v47 = vshll.u32 %v1521_v30, %v564_v21  ;;  %v576_v61 = vshll.u32 %v1523_v34, %v564_v21  ;;  %v573_v16 = vshll.u32 %v1522_v32, %v564_v21 }
  0x79   :  { %v1837_v12 = vshrl.u32 %v495_v44, 30  ;;  %v568_v48 = vshrl.u32 %v1521_v30, %v1830_v7  ;;  %v571_v57 = vshrl.u32 %v1522_v32, %v1830_v7  ;;  %v574_v18 = vshrl.u32 %v1523_v34, %v1830_v7 }
  0x7a   :  { %v577_v19 = vshrl.u32 %v1524_v36, %v1830_v7  ;;  %v1859_v30 = vmul.f32 %v1835_v62, %v1835_v62  ;;  %v579_v32 = vshll.u32 %v1524_v36, %v564_v21  ;;  %v580_v34 = vshrl.u32 %v1525_v45, %v1830_v7 }
  0x7b   :  { %v497_v15 = vshll.u32 %v1837_v12, 30  ;;  %v1861_v24 = vor.u32 %v568_v48, %v567_v14  ;;  %v1863_v59 = vor.u32 %v571_v57, %v570_v47  ;;  %v575_v60 = vor.u32 %v574_v18, %v573_v16 }
  0x7c   :  { %v578_v33 = vor.u32 %v577_v19, %v576_v61  ;;  %vm582_vm8 = vcmp.lt.s32.totalorder %v1849_v63, 1  ;;  %v225_v23 = vadd.f32 0.008332121, %v224_v2  ;;  %vm584_vm9 = vcmp.lt.s32.totalorder %v1849_v63, 3 }
  0x7d   :  { %v498_v27 = vsub.s32 %v494_v55, %v497_v15  ;;  %vm585_vm10 = vcmp.lt.s32.totalorder %v1849_v63, 4  ;;  %v378_v20 = vmul.f32 -0.00019511016, %v1859_v30  ;;  %vm583_vm11 = vcmp.lt.s32.totalorder %v1849_v63, 2 }
  0x7e   :  { %v1874_v36 = vshll.u32 %v558_v29, 8  ;;  %v581_v49 = vor.u32 %v580_v34, %v579_v32  ;;  %v590_v41 = vsel %vm582_vm8, %v1861_v24, %v1863_v59  ;;  %v591_v43 = vsel %vm585_vm10, %v578_v33, 920167782 }
  0x7f   :  { %vm499_vm7 = vcmp.lt.s32.totalorder %v498_v27, 0  ;;  %v500_v26 = vsub.s32 0, %v498_v27  ;;  %v592_v40 = vsel %vm584_vm9, %v575_v60, %v591_v43  ;;  %v218_v8 = vadd.f32 0.041655596, %v217_v25 }
  0x80   :  { %v593_v46 = vsel %vm583_vm11, %v590_v41, %v592_v40  ;;  %v226_v31 = vmul.f32 %v225_v23, %v1828_v58  ;;  %v371_v55 = vmul.f32 -0.001358992, %v1859_v30  ;;  %v599_v17 = vand.u32 65535, %v1874_v36 }
  0x81   :  { %v501_v39 = vsel %vm499_vm7, %v500_v26, %v498_v27  ;;  %v624_v21 = vshrl.u32 %v593_v46, 16  ;;  %v379_v44 = vadd.f32 0.008332121, %v378_v20  ;;  %v595_v14 = vsel %vm585_vm10, %v581_v49, 1326507024 }
  0x82   :  { %v502_v45 = vclz %v501_v39  ;;  %v594_v47 = vsel %vm582_vm8, %v1863_v59, %v575_v60  ;;  %v600_v57 = vshrl.u32 %v1874_v36, 16  ;;  %v623_v61 = vand.u32 65535, %v593_v46 }
  0x83   :  { %v219_v15 = vmul.f32 %v218_v8, %v1828_v58  ;;  %v227_v19 = vadd.f32 -0.16666654, %v226_v31  ;;  %v372_v29 = vadd.f32 0.041655596, %v371_v55  ;;  %v596_v37 = vsel %vm584_vm9, %v578_v33, %v595_v14 }
  0x84   :  { %v1389_v38 = vadd.s32 4294967294, %v502_v45  ;;  %v626_v52 = vmul.u32 %v624_v21, %v599_v17  ;;  %v380_v32 = vmul.f32 %v379_v44, %v1859_v30  ;;  %v597_v25 = vsel %vm583_vm11, %v594_v47, %v596_v37 }
  0x85   :  { %v566_v23 = vshrl.u32 %v1520_v28, %v1830_v7  ;;  %v602_v20 = vshrl.u32 %v597_v25, 16  ;;  %v627_v39 = vmul.u32 %v623_v61, %v600_v57  ;;  %v625_v41 = vmul.u32 %v623_v61, %v599_v17 }
  0x86   :  { %vm1390_vm12 = vcmp.lt.s32.totalorder %v1389_v38, 0  ;;  %v629_v43 = vshll.u32 %v626_v52, 16  ;;  %v587_v40 = vsel %vm585_vm10, %v575_v60, 2102212464  ;;  %v628_v31 = vmul.u32 %v624_v21, %v600_v57 }
  0x87   :  { %v505_v48 = vsel %vm1390_vm12, 0, %v1389_v38  ;;  %v604_v28 = vmul.u32 %v602_v20, %v599_v17  ;;  %v631_v55 = vshll.u32 %v627_v39, 16  ;;  %v586_v42 = vsel %vm582_vm8, %v566_v23, %v1861_v24 }
  0x88   :  { %v506_v16 = vsub.s32 32, %v505_v48  ;;  %v507_v18 = vshll.u32 %v498_v27, %v505_v48  ;;  %v510_v2 = vsub.s32 4294967266, %v505_v48  ;;  %v601_v27 = vand.u32 65535, %v597_v25 }
  0x89   :  { %v606_v44 = vmul.u32 %v602_v20, %v600_v57  ;;  %v588_v60 = vsel %vm584_vm9, %v1863_v59, %v587_v40  ;;  %vm633_vm15 = vc.u32 %v625_v41, %v629_v43  ;;  %v630_v61 = vshrl.u32 %v626_v52, 16 }
  0x8a   :  { %v508_v34 = vshrl.u32 %v490_v11, %v506_v16  ;;  %v511_v26 = vadd.s32 127, %v510_v2  ;;  %v603_v8 = vmul.u32 %v601_v27, %v599_v17  ;;  %v605_v7 = vmul.u32 %v601_v27, %v600_v57 }
  0x8b   :  { %v607_v11 = vshll.u32 %v604_v28, 16  ;;  %v635_v17 = vadd.s32 %v629_v43, %v625_v41  ;;  %v634_v21 = vsel %vm633_vm15, 1, %v1526_v50  ;;  %v608_v57 = vshrl.u32 %v604_v28, 16 }
  0x8c   :  { %v509_v45 = vor.u32 %v508_v34, %v507_v18  ;;  %v512_v49 = vshll.u32 %v511_v26, 23  ;;  %v609_v14 = vshll.u32 %v605_v7, 16  ;;  %v636_v24 = vadd.s32 %v634_v21, %v628_v31 }
  0x8d   :  { %vm611_vm0 = vc.u32 %v603_v8, %v607_v11  ;;  %v613_v47 = vadd.s32 %v607_v11, %v603_v8  ;;  %vm637_vm2 = vc.u32 %v635_v17, %v631_v55  ;;  %v632_v26 = vshrl.u32 %v627_v39, 16 }
  0x8e   :  { %v513_v38 = vor.u32 4788187, %v512_v49  ;;  %v516_v46 = vcvt.s32.f32 %v509_v45  ;;  %v612_v18 = vsel %vm611_vm0, 1, %v1526_v50  ;;  %v638_v37 = vsel %vm637_vm2, 1, %v1526_v50 }
  0x8f   :  { %v614_v2 = vadd.s32 %v612_v18, %v606_v44  ;;  %vm615_vm5 = vc.u32 %v613_v47, %v609_v14  ;;  %v640_v25 = vadd.s32 %v638_v37, %v636_v24  ;;  %v220_v23 = vadd.f32 -0.4999988, %v219_v15 }
  0x90   :  { %v514_v48 = vand.u32 2147483647, %v513_v38  ;;  %v616_v59 = vsel %vm615_vm5, 1, %v1526_v50  ;;  %v373_v52 = vmul.f32 %v372_v29, %v1859_v30  ;;  %v610_v27 = vshrl.u32 %v605_v7, 16 }
  0x91   :  { %v618_v20 = vadd.s32 %v616_v59, %v614_v2  ;;  %v228_v45 = vmul.f32 %v227_v19, %v1828_v58  ;;  %v589_v41 = vsel %vm583_vm11, %v586_v42, %v588_v60  ;;  %v641_v43 = vadd.s32 %v640_v25, %v630_v61 }
  0x92   :  { %v517_v16 = vmul.f32 %v516_v46, %v514_v48  ;;  %v381_v40 = vadd.f32 -0.16666654, %v380_v32  ;;  %v1939_v39 = vadd.s32 %v635_v17, %v631_v55  ;;  %v1941_v29 = vstv %s69_s2 }
  0x93   :  { %v619_v15 = vadd.s32 %v618_v20, %v608_v57  ;;  %v213_v19 = vsel %vm90_vm1, %v212_v56, %v1683_v9  ;;  %v642_v32 = vadd.s32 %v641_v43, %v632_v26  ;;  %v366_v8 = vsub.s32 4, %v1741_v35 }
  0x94   :  { %v518_v34 = vxor.u32 2147483648, %v517_v16  ;;  %v374_v28 = vadd.f32 -0.4999988, %v373_v52  ;;  %v643_v38 = vmul.u32 %v1874_v36, %v589_v41  ;;  %v221_v46 = vmul.f32 %v220_v23, %v1828_v58 }
  0x95   :  { %v1951_v7 = vadd.s32 %v619_v15, %v610_v27  ;;  %v646_v42 = vadd.s32 1, %v642_v32  ;;  %v71_v44 = vmul.f32 %v1941_v29, %v1557_v0  ;;  %v229_v9 = vadd.f32 1.0, %v228_v45 }
  0x96   :  { %v519_v49 = vsel %vm398_vm13, %v518_v34, %v517_v16  ;;  %v382_v56 = vmul.f32 %v381_v40, %v1859_v30  ;;  %v1962_v11 = vsel %vm1805_vm3, 0, %v213_v19  ;;  %v72_v58 = vmul.f32 %v1941_v29, %v1559_v1 }
  0x97   :  { %v1937_v50 = vsel %vm1911_vm14, %v1578_v10, %v519_v49  ;;  %vm645_vm1 = vc.u32 %v1951_v7, %v1939_v39  ;;  %v232_v60 = vand.u32 3, %v1962_v11  ;;  %v367_v0 = vsel %vm244_vm4, %v366_v8, %v1741_v35 }
  0x98   :  { %v524_v63 = vmul.f32 %v1937_v50, %v1937_v50  ;;  %v647_v48 = vsel %vm645_vm1, %v646_v42, %v642_v32  ;;  %v1970_v47 = vadd.f32 1.0, %v221_v46  ;;  %v375_v61 = vmul.f32 %v374_v28, %v1859_v30 }
  0x99   :  { %v648_v17 = vadd.s32 %v647_v48, %v643_v38  ;;  %v1974_v16 = vmul.f32 %v229_v9, %v1815_v51  ;;  %v383_v18 = vadd.f32 1.0, %v382_v56  ;;  %v520_v24 = vsub.s32 4, %v1837_v12 }
  0x9a   :  { %v525_v31 = vmul.f32 -0.001358992, %v524_v63  ;;  %v532_v55 = vmul.f32 -0.00019511016, %v524_v63  ;;  %v73_v57 = vmul.f32 %v1941_v29, %v1571_v5  ;;  %v75_v2 = vmul.f32 1.442695, %v71_v44 }
  0x9b   :  { %v649_v1 = vadd.s32 536870912, %v648_v17  ;;  %vm234_vm3 = vcmp.eq.s32.totalorder %v232_v60, 0  ;;  %vm237_vm4 = vcmp.eq.s32.totalorder %v232_v60, 2  ;;  %v369_v30 = vsel %vm1820_vm6, 0, %v367_v0 }
  0x9c   :  { %v526_v14 = vadd.f32 0.041655596, %v525_v31  ;;  %v533_v36 = vadd.f32 0.008332121, %v532_v55  ;;  %v238_v51 = vxor.u32 2147483648, %v1970_v47  ;;  %v1984_v59 = vadd.f32 1.0, %v375_v61 }
  0x9d   :  { %v1981_v34 = vshrl.u32 %v649_v1, 30  ;;  %v386_v26 = vand.u32 3, %v369_v30  ;;  %v235_v23 = vxor.u32 2147483648, %v1974_v16  ;;  %v1988_v5 = vmul.f32 %v383_v18, %v1835_v62 }
  0x9e   :  { %v527_v22 = vmul.f32 %v526_v14, %v524_v63  ;;  %v534_v21 = vmul.f32 %v533_v36, %v524_v63  ;;  %v521_v52 = vsel %vm398_vm13, %v520_v24, %v1837_v12  ;;  %v77_v27 = vmul.f32 1.442695, %v72_v58 }
  0x9f   :  { %v651_v13 = vshll.u32 %v1981_v34, 30  ;;  %v79_v20 = vmul.f32 1.442695, %v73_v57  ;;  %vm233_vm6 = vcmp.lt.s32.totalorder %v232_v60, 2  ;;  %v236_v49 = vsel %vm234_vm3, %v1970_v47, %v235_v23 }
  0xa0   :  { %v528_v37 = vadd.f32 -0.4999988, %v527_v22  ;;  %v535_v35 = vadd.f32 -0.16666654, %v534_v21  ;;  %v239_v62 = vsel %vm237_vm4, %v238_v51, %v1974_v16  ;;  %vm388_vm7 = vcmp.eq.s32.totalorder %v386_v26, 0 }
  0xa1   :  { %v2002_v43 = vsub.s32 %v648_v17, %v651_v13  ;;  %vm391_vm8 = vcmp.eq.s32.totalorder %v386_v26, 2  ;;  %v392_v12 = vxor.u32 2147483648, %v1984_v59  ;;  %v523_v40 = vsel %vm1911_vm14, 0, %v521_v52 }
  0xa2   :  { %v536_v25 = vmul.f32 %v535_v35, %v524_v63  ;;  %v529_v45 = vmul.f32 %v528_v37, %v524_v63  ;;  %v389_v15 = vxor.u32 2147483648, %v1988_v5  ;;  %v540_v19 = vand.u32 3, %v523_v40 }
  0xa3   :  { %vm653_vm9 = vcmp.lt.s32.totalorder %v2002_v43, 0  ;;  %v654_v63 = vsub.s32 0, %v2002_v43  ;;  %1417 = vpow2.f32 %v75_v2  ;;  %v240_v32 = vsel %vm233_vm6, %v236_v49, %v239_v62  ;;  %v67_v49 = vld [vmem:[#allocation6 + $0x10] sm:$0xff] }
  0xa4   :  { %v537_v41 = vadd.f32 1.0, %v536_v25  ;;  %vm387_vm10 = vcmp.lt.s32.totalorder %v386_v26, 2  ;;  %v2010_v8 = vadd.f32 1.0, %v529_v45  ;;  %v390_v28 = vsel %vm388_vm7, %v1984_v59, %v389_v15 }
  0xa5   :  { %v393_v38 = vsel %vm391_vm8, %v392_v12, %v1988_v5  ;;  %v655_v46 = vsel %vm653_vm9, %v654_v63, %v2002_v43  ;;  %1419 = vpow2.f32 %v77_v27  ;;  %vm231_vm11 = vweird.f32 %v1565_v3 }
  0xa6   :  { %v2017_v33 = vmul.f32 %v537_v41, %v1937_v50  ;;  %v656_v31 = vclz %v655_v46  ;;  %1421 = vpow2.f32 %v79_v20  ;;  %v2023_v55 = vsel %vm231_vm11, nan, %v240_v32 }
  0xa7   :  { %vm545_vm12 = vcmp.eq.s32.totalorder %v540_v19, 2  ;;  %vm385_vm13 = vweird.f32 %v1569_v4  ;;  %v394_v42 = vsel %vm387_vm10, %v390_v28, %v393_v38  ;;  %vm542_vm14 = vcmp.eq.s32.totalorder %v540_v19, 0 }
  0xa8   :  { %v546_v44 = vxor.u32 2147483648, %v2010_v8  ;;  %v1392_v50 = vadd.s32 4294967294, %v656_v31  ;;  %v543_v9 = vxor.u32 2147483648, %v2017_v33  ;;  %v848_v56 = vadd.s32 3, %v1962_v11 }
  0xa9   :  { %v1003_v14 = vadd.s32 3, %v369_v30  ;;  %v1158_v36 = vadd.s32 3, %v523_v40  ;;  %v2029_v48 = vpop.eup %1417  ;;  %vm541_vm15 = vcmp.lt.s32.totalorder %v540_v19, 2  ;;  %v644_v60 = vadd.s32 %v1939_v39, %v1951_v7 }
  0xaa   :  { %v547_v58 = vsel %vm545_vm12, %v546_v44, %v2017_v33  ;;  %vm1393_vm0 = vcmp.lt.s32.totalorder %v1392_v50, 0  ;;  %v544_v0 = vsel %vm542_vm14, %v2010_v8, %v543_v9  ;;  %v849_v61 = vand.u32 3, %v848_v56 }
  0xab   :  { %v659_v17 = vsel %vm1393_vm0, 0, %v1392_v50  ;;  %v1004_v22 = vand.u32 3, %v1003_v14  ;;  %v2037_v21 = vpop.eup %1419  ;;  %vm539_vm2 = vweird.f32 %v1578_v10  ;;  %v1159_v39 = vand.u32 3, %v1158_v36 }
  0xac   :  { %v660_v11 = vsub.s32 32, %v659_v17  ;;  %v661_v18 = vshll.u32 %v2002_v43, %v659_v17  ;;  %v664_v24 = vsub.s32 4294967266, %v659_v17  ;;  %v2041_v1 = vpop.eup %1421  ;;  %vm851_vm5 = vcmp.eq.s32.totalorder %v849_v61, 0 }
  0xad   :  { %vm854_vm1 = vcmp.eq.s32.totalorder %v849_v61, 2  ;;  %vm1006_vm3 = vcmp.eq.s32.totalorder %v1004_v22, 0  ;;  %v548_v7 = vsel %vm541_vm15, %v544_v0, %v547_v58  ;;  %vm850_vm4 = vcmp.lt.s32.totalorder %v849_v61, 2 }
  0xae   :  { %v662_v57 = vshrl.u32 %v644_v60, %v660_v11  ;;  %v665_v2 = vadd.s32 127, %v664_v24  ;;  %v853_v37 = vsel %vm851_vm5, %v1970_v47, %v235_v23  ;;  %v856_v35 = vsel %vm854_vm1, %v238_v51, %v1974_v16 }
  0xaf   :  { %vm1005_vm6 = vcmp.lt.s32.totalorder %v1004_v22, 2  ;;  %v1008_v30 = vsel %vm1006_vm3, %v1984_v59, %v389_v15  ;;  %v857_v52 = vsel %vm850_vm4, %v853_v37, %v856_v35  ;;  %vm1009_vm7 = vcmp.eq.s32.totalorder %v1004_v22, 2  ;;  %v65_v59 = vld [vmem:[#allocation6] sm:$0xff] }
  0xb0   :  { %v663_v26 = vor.u32 %v662_v57, %v661_v18  ;;  %v666_v25 = vshll.u32 %v665_v2, 23  ;;  %v858_v13 = vsel %vm231_vm11, nan, %v857_v52  ;;  %v1011_v27 = vsel %vm1009_vm7, %v392_v12, %v1988_v5  ;;  %v66_v5 = vld [vmem:[#allocation6 + $0x8] sm:$0xff] }
  0xb1   :  { %vm1160_vm8 = vcmp.lt.s32.totalorder %v1159_v39, 2  ;;  %vm1161_vm9 = vcmp.eq.s32.totalorder %v1159_v39, 0  ;;  %v1012_v16 = vsel %vm1005_vm6, %v1008_v30, %v1011_v27  ;;  %v395_v20 = vsel %vm385_vm13, nan, %v394_v42  ;;  %v68_v27 = vld [vmem:[#allocation6 + $0x18] sm:$0xff] }
  0xb2   :  { %v667_v23 = vor.u32 4788187, %v666_v25  ;;  %v670_v47 = vcvt.s32.f32 %v663_v26  ;;  %v1163_v51 = vsel %vm1161_vm9, %v2010_v8, %v543_v9  ;;  %v1013_v45 = vsel %vm385_vm13, nan, %v1012_v16 }
  0xb3   :  { %vm1164_vm10 = vcmp.eq.s32.totalorder %v1159_v39, 2  ;;  %v2066_v3 = vstv %s2034_s26  ;;  %v549_v40 = vsel %vm539_vm2, nan, %v548_v7  ;;  %vm552_vm11 = vcmp.lt.s32.totalorder %v1779_v54, 0 }
  0xb4   :  { %v668_v62 = vand.u32 2147483647, %v667_v23  ;;  %v1166_v41 = vsel %vm1164_vm10, %v546_v44, %v2017_v33  ;;  %v1325_v43 = vmul.f32 %v2066_v3, %v858_v13  ;;  %v1326_v12 = vmul.f32 %v2066_v3, %v1013_v45 }
  0xb5   :  { %v674_v4 = vsub.s32 4, %v1981_v34  ;;  %v1167_v15 = vsel %vm1160_vm8, %v1163_v51, %v1166_v41  ;;  %v1329_v32 = vstv %s2043_s27  ;;  %v2080_v8 = vstv %s2045_s28 }
  0xb6   :  { %v671_v19 = vmul.f32 %v670_v47, %v668_v62  ;;  %v1168_v63 = vsel %vm539_vm2, nan, %v1167_v15  ;;  %v1330_v38 = vmul.f32 %v1329_v32, %v65_v59  ;;  %v1331_v33 = vmul.f32 %v1329_v32, %v66_v5 }
  0xb7   :  { %v1327_v28 = vmul.f32 %v2066_v3, %v1168_v63  ;;  %v1332_v46 = vmul.f32 %v1329_v32, %v67_v49  ;;  %vm2085_vm12 = vcmp.le.f32.partialorder %v550_v6, 0.7853982  ;;  %v1343_v44 = vadd.f32 %v1325_v43, %v2023_v55 }
  0xb8   :  { %v672_v42 = vxor.u32 2147483648, %v671_v19  ;;  %v1344_v50 = vadd.f32 %v1326_v12, %v395_v20  ;;  %v1335_v10 = vsub.f32 %v2080_v8, %v1330_v38  ;;  %v1336_v9 = vsub.f32 %v2080_v8, %v1331_v33 }
  0xb9   :  { %v1337_v56 = vsub.f32 %v2080_v8, %v1332_v46  ;;  %v1345_v14 = vadd.f32 %v1327_v28, %v549_v40  ;;  %v675_v6 = vsel %vm552_vm11, %v674_v4, %v1981_v34  ;;  %v74_v2 = vmul.f32 %v1941_v29, %v1772_v53 }
  0xba   :  { %v673_v36 = vsel %vm552_vm11, %v672_v42, %v671_v19  ;;  %v1339_v55 = vmul.f32 %v2029_v48, %v1335_v10  ;;  %v1340_v60 = vmul.f32 %v2037_v21, %v1336_v9  ;;  %v677_v18 = vsel %vm2085_vm12, 0, %v675_v6 }
  0xbb   :  { %v676_v58 = vsel %vm2085_vm12, %v1779_v54, %v673_v36  ;;  %v1341_v0 = vmul.f32 %v2041_v1, %v1337_v56  ;;  %v1313_v21 = vadd.s32 3, %v677_v18  ;;  %v81_v30 = vmul.f32 1.442695, %v74_v2 }
  0xbc   :  { %v678_v17 = vmul.f32 %v676_v58, %v676_v58  ;;  %v1347_v61 = vmul.f32 %v1343_v44, %v1339_v55  ;;  %v1348_v22 = vmul.f32 %v1344_v50, %v1340_v60  ;;  %v694_v52 = vand.u32 3, %v677_v18 }
  0xbd   :  { %v1349_v11 = vmul.f32 %v1345_v14, %v1341_v0  ;;  %v1314_v13 = vand.u32 3, %v1313_v21  ;;  %1423 = vpow2.f32 %v81_v30  ;;  %v1333_v53 = vmul.f32 %v1329_v32, %v68_v27 }
  0xbe   :  { %v679_v24 = vmul.f32 -0.001358992, %v678_v17  ;;  %v686_v39 = vmul.f32 -0.00019511016, %v678_v17  ;;  %v1351_v34 = vadd.f32 %v1347_v61, %v1330_v38  ;;  %v1352_v7 = vadd.f32 %v1348_v22, %v1331_v33 }
  0xbf   :  { %v1353_v57 = vadd.f32 %v1349_v11, %v1332_v46  ;;  %vm699_vm13 = vcmp.eq.s32.totalorder %v694_v52, 2  ;;  %vm1319_vm14 = vcmp.eq.s32.totalorder %v1314_v13, 2  ;;  %vm695_vm15 = vcmp.lt.s32.totalorder %v694_v52, 2 }
  0xc0   :  { %v680_v48 = vadd.f32 0.041655596, %v679_v24  ;;  %v687_v37 = vadd.f32 0.008332121, %v686_v39  ;;  %1355 = vst [vmem:[#allocation9] sm:$0xff] %v1351_v34  ;;  %vm696_vm0 = vcmp.eq.s32.totalorder %v694_v52, 0  ;;  %vm693_vm1 = vweird.f32 %v1779_v54 }
  0xc1   :  { %1356 = vst [vmem:[#allocation9 + $0x8] sm:$0xff] %v1352_v7  ;;  %vm1316_vm2 = vcmp.eq.s32.totalorder %v1314_v13, 0  ;;  %vm1315_vm5 = vcmp.lt.s32.totalorder %v1314_v13, 2  ;;  %v1338_v49 = vsub.f32 %v2080_v8, %v1333_v53 }
  0xc2   :  { %v681_v1 = vmul.f32 %v680_v48, %v678_v17  ;;  %v688_v35 = vmul.f32 %v687_v37, %v678_v17  ;;  %1357 = vst [vmem:[#allocation9 + $0x10] sm:$0xff] %v1353_v57 }
  0xc3   :  { %v1424_v62 = vpop.eup %1423 }
  0xc4   :  { %v682_v26 = vadd.f32 -0.4999988, %v681_v1  ;;  %v689_v25 = vadd.f32 -0.16666654, %v688_v35  ;;  %v1342_v63 = vmul.f32 %v1424_v62, %v1338_v49 }
  0xc6   :  { %v683_v23 = vmul.f32 %v682_v26, %v678_v17  ;;  %v690_v47 = vmul.f32 %v689_v25, %v678_v17 }
  0xc8   :  { %v684_v16 = vadd.f32 1.0, %v683_v23  ;;  %v691_v51 = vadd.f32 1.0, %v690_v47 }
  0xca   :  { %v692_v29 = vmul.f32 %v691_v51, %v676_v58  ;;  %v700_v20 = vxor.u32 2147483648, %v684_v16 }
  0xcc   :  { %v697_v45 = vxor.u32 2147483648, %v692_v29  ;;  %v701_v59 = vsel %vm699_vm13, %v700_v20, %v692_v29  ;;  %v1321_v5 = vsel %vm1319_vm14, %v700_v20, %v692_v29 }
  0xce   :  { %v698_v41 = vsel %vm696_vm0, %v684_v16, %v697_v45  ;;  %v1318_v43 = vsel %vm1316_vm2, %v684_v16, %v697_v45 }
  0xcf   :  { %v702_v12 = vsel %vm695_vm15, %v698_v41, %v701_v59  ;;  %v1322_v40 = vsel %vm1315_vm5, %v1318_v43, %v1321_v5 }
  0xd0   :  { %v703_v4 = vsel %vm693_vm1, nan, %v702_v12  ;;  %v1323_v15 = vsel %vm693_vm1, nan, %v1322_v40 }
  0xd1   :  { %v1328_v19 = vmul.f32 %v2066_v3, %v1323_v15 }
  0xd3   :  { %v1346_v32 = vadd.f32 %v1328_v19, %v703_v4 }
  0xd5   :  { %v1350_v54 = vmul.f32 %v1346_v32, %v1342_v63 }
  0xd7   :  { %v1354_v28 = vadd.f32 %v1350_v54, %v1333_v53 }
  0xd9   :  { %1358 = vst [vmem:[#allocation9 + $0x18] sm:$0xff] %v1354_v28 }
  0xda   :  { %1369 = dma.vmem_to_hbm [thread:$0]  %s1365_s30, 512, %s1367_s6, [#allocation4]  }
  0xdb   :  { %1515 = dma.done.wait [#allocation4], 512  }
  0xdc   :  { %1516 = vsyncadd [#allocation4], 4294966784 }
  0xdd   :  { %1374 = vsyncpa [#allocation3], 1 }
  0xde   :  { %1375 = vsyncpa [#allocation8], 1 }
  0xdf   :  { %1376 = vsyncpa [#allocation4], 1 }
  0xe0   :  { %1377 = vsyncpa [#allocation5], 1 }

</bundles_post_ra>
